<compile_context>
chip_gen: v6e
topology: v6e:2x2x1
jax: 0.10.0
libtpu: 0.0.40
codegen_flags: <defaults>
</compile_context>

<pallas_src>
import jax
import jax.numpy as jnp
from jax.experimental import pallas as pl
from jax.experimental.pallas import tpu as pltpu

LANE = 128      # lane width: hidden dim padded to a multiple of this
SUBLANE = 8     # sublane quantum: batch tile rows rounded to this
MAX_TB = 4096   # cap on rows per batch tile (few MiB of VMEM at f32)


def _round_up(n, m):
    return ((n + m - 1) // m) * m


def _policy_kernel(x_ref, w1_ref, b1_ref, w2_ref, b2_ref, w3_ref, b3_ref,
                   out_ref):
    """Fused MLP encoder + fc + tanh on one (TB, obs_dim) batch tile.

    x_ref  : (TB, D)            (D = native obs_dim)
    w1_ref : (D,  Hp)   b1_ref : (1, Hp)
    w2_ref : (Hp, Hp)   b2_ref : (1, Hp)
    w3_ref : (Hp, A)    b3_ref : (1, A)   (A = native action_size)
    out_ref: (TB, A)
    """
    x = x_ref[...]

    # encoder layer 1: Linear + ReLU  (K = native obs_dim; fine on MXU)
    h1 = jnp.dot(x, w1_ref[...], preferred_element_type=jnp.float32)
    h1 = jnp.maximum(h1 + b1_ref[...], 0.0)

    # encoder layer 2: Linear + ReLU  (lane-dense 128-wide hidden)
    h2 = jnp.dot(h1, w2_ref[...], preferred_element_type=jnp.float32)
    h2 = jnp.maximum(h2 + b2_ref[...], 0.0)

    # fc head: Linear + tanh at native action width
    raw = jnp.dot(h2, w3_ref[...], preferred_element_type=jnp.float32)
    raw = raw + b3_ref[...]
    out_ref[...] = jnp.tanh(raw).astype(out_ref.dtype)


def prepare_params(params):
    """Pads only the hidden dimension to a lane-aligned width (exact zero
    padding). Call once and reuse — keeps jnp.pad out of the forward path."""
    w1, b1, w2, b2, w3, b3 = params
    obs_dim, hidden = w1.shape
    action_size = w3.shape[1]
    Hp = _round_up(hidden, LANE)

    def pad2(a, rows, cols):
        a = a.astype(jnp.float32)
        return jnp.pad(a, ((0, rows - a.shape[0]), (0, cols - a.shape[1])))

    w1p, b1p = pad2(w1, obs_dim, Hp), pad2(b1, 1, Hp)
    w2p, b2p = pad2(w2, Hp, Hp), pad2(b2, 1, Hp)
    w3p, b3p = pad2(w3, Hp, action_size), pad2(b3, 1, action_size)
    return (w1p, b1p, w2p, b2p, w3p, b3p)


def deterministic_policy_forward(x, padded_params):
    """Fused DeterministicPolicy forward: tanh(fc(encoder(x))).

    x is (batch, obs_dim) at native widths; output is (batch, action_size)
    with no wrapper-side padding or slicing.
    """
    w1p, b1p, w2p, b2p, w3p, b3p = padded_params
    batch, obs_dim = x.shape
    action_size = w3p.shape[1]

    if x.dtype != jnp.float32:
        x = x.astype(jnp.float32)

    # Batch tile: for tiny batches use the whole batch (single full block);
    # otherwise split into >=2 tiles (multiple of 8) so the "parallel" batch
    # axis can feed both TensorCores on v7x, capped at MAX_TB.
    if batch <= SUBLANE:
        TB = batch
    else:
        TB = min(MAX_TB, _round_up(pl.cdiv(batch, 2), SUBLANE))
    grid = (pl.cdiv(batch, TB),)

    # Weights/biases: constant block index -> VMEM-resident across the grid.
    const = lambda a: pl.BlockSpec(a.shape, lambda i: (0, 0))

    out = pl.pallas_call(
        _policy_kernel,
        out_shape=jax.ShapeDtypeStruct((batch, action_size), jnp.float32),
        grid=grid,
        in_specs=[
            pl.BlockSpec((TB, obs_dim), lambda i: (i, 0)),   # x: batch-tiled
            const(w1p), const(b1p),
            const(w2p), const(b2p),
            const(w3p), const(b3p),
        ],
        out_specs=pl.BlockSpec((TB, action_size), lambda i: (i, 0)),
        compiler_params=pltpu.CompilerParams(
            dimension_semantics=("parallel",),        # shard batch across TCs
            vmem_limit_bytes=32 * 1024 * 1024,        # safe on v5e/v6e/v7x
        ),
    )(x, w1p, b1p, w2p, b2p, w3p, b3p)

    return out


def init_params(key, obs_dim, hidden, action_size):
    """Deterministic Kaiming-uniform-ish init matching nn.Linear shapes,
    stored as (in_dim, out_dim) so the kernel computes x @ W + b."""
    ks = jax.random.split(key, 6)

    def linear(kw, kb, fan_in, fan_out):
        bound = 1.0 / jnp.sqrt(jnp.float32(fan_in))
        w = jax.random.uniform(kw, (fan_in, fan_out), jnp.float32, -bound, bound)
        b = jax.random.uniform(kb, (1, fan_out), jnp.float32, -bound, bound)
        return w, b

    w1, b1 = linear(ks[0], ks[1], obs_dim, hidden)
    w2, b2 = linear(ks[2], ks[3], hidden, hidden)
    w3, b3 = linear(ks[4], ks[5], hidden, action_size)
    return (w1, b1, w2, b2, w3, b3)


def reference_forward(x, params):
    """Pure-JAX reference of the same forward pass."""
    w1, b1, w2, b2, w3, b3 = params
    h = jnp.maximum(x @ w1 + b1, 0.0)
    h = jnp.maximum(h @ w2 + b2, 0.0)
    return jnp.tanh(h @ w3 + b3)


if __name__ == "__main__":
    key = jax.random.PRNGKey(0)
    k_x, k_p, k_x2, k_x3 = jax.random.split(key, 4)

    obs_dim, hidden, action_size = 16, 32, 4
    params = init_params(k_p, obs_dim, hidden, action_size)
    padded = prepare_params(params)   # hoisted out of the per-call hot path

    # Small shape consistent with the module (single full-block path).
    batch = 2
    x = jax.random.normal(k_x, (batch, obs_dim), jnp.float32)
    out = jax.block_until_ready(deterministic_policy_forward(x, padded))
    ref = reference_forward(x, params)
    assert out.shape == (batch, action_size)
    assert jnp.allclose(out, ref, atol=1e-5, rtol=1e-5), "mismatch (small batch)"

    # Larger batch exercising the 2-step parallel grid + ragged final block.
    batch2 = 2500
    x2 = jax.random.normal(k_x2, (batch2, obs_dim), jnp.float32)
    out2 = jax.block_until_ready(deterministic_policy_forward(x2, padded))
    ref2 = reference_forward(x2, params)
    assert out2.shape == (batch2, action_size)
    assert jnp.allclose(out2, ref2, atol=1e-5, rtol=1e-5), "mismatch (tiled batch)"

    # Mid-size batch that hits an exact multiple of the tile size.
    batch3 = 64
    x3 = jax.random.normal(k_x3, (batch3, obs_dim), jnp.float32)
    out3 = jax.block_until_ready(deterministic_policy_forward(x3, padded))
    ref3 = reference_forward(x3, params)
    assert out3.shape == (batch3, action_size)
    assert jnp.allclose(out3, ref3, atol=1e-5, rtol=1e-5), "mismatch (mid batch)"

    print("KERNEL_OK")
</pallas_src>

<mosaic_0001>
module attributes {stable_mosaic.version = 11 : i64} {
  func.func @_policy_kernel(%arg0: i32, %arg1: memref<2x16xf32, #tpu.memory_space<vmem>>, %arg2: memref<16x128xf32, #tpu.memory_space<vmem>>, %arg3: memref<1x128xf32, #tpu.memory_space<vmem>>, %arg4: memref<128x128xf32, #tpu.memory_space<vmem>>, %arg5: memref<1x128xf32, #tpu.memory_space<vmem>>, %arg6: memref<128x4xf32, #tpu.memory_space<vmem>>, %arg7: memref<1x4xf32, #tpu.memory_space<vmem>>, %arg8: memref<2x4xf32, #tpu.memory_space<vmem>>) attributes {dimension_semantics = [#tpu.dimension_semantics<parallel>], iteration_bounds = array<i64: 1>, scalar_prefetch = 0 : i64, scratch_operands = 0 : i64, tpu.core_type = #tpu.core_type<tc>, window_params = [{transform_indices = @transform_0, window_bounds = array<i64: 2, 16>}, {pipeline_mode = #tpu.pipeline_mode<synchronous>, transform_indices = @transform_1, window_bounds = array<i64: 16, 128>}, {pipeline_mode = #tpu.pipeline_mode<synchronous>, transform_indices = @transform_2, window_bounds = array<i64: 1, 128>}, {pipeline_mode = #tpu.pipeline_mode<synchronous>, transform_indices = @transform_3, window_bounds = array<i64: 128, 128>}, {pipeline_mode = #tpu.pipeline_mode<synchronous>, transform_indices = @transform_4, window_bounds = array<i64: 1, 128>}, {pipeline_mode = #tpu.pipeline_mode<synchronous>, transform_indices = @transform_5, window_bounds = array<i64: 128, 4>}, {pipeline_mode = #tpu.pipeline_mode<synchronous>, transform_indices = @transform_6, window_bounds = array<i64: 1, 4>}, {transform_indices = @transform_7, window_bounds = array<i64: 2, 4>}]} {
    %c0 = arith.constant 0 : index
    %c0_0 = arith.constant 0 : index
    %0 = vector.load %arg1[%c0, %c0_0] : memref<2x16xf32, #tpu.memory_space<vmem>>, vector<2x16xf32>
    %c0_1 = arith.constant 0 : index
    %c0_2 = arith.constant 0 : index
    %1 = vector.load %arg2[%c0_1, %c0_2] : memref<16x128xf32, #tpu.memory_space<vmem>>, vector<16x128xf32>
    %cst = arith.constant dense<0.000000e+00> : vector<2x128xf32>
    %2 = tpu.matmul %0, %1, %cst {dimension_numbers = #tpu.dot_dimension_numbers<[1], [0], [0], [1], [0, 0, 1, 1], [], []>} : vector<2x16xf32>, vector<16x128xf32>, vector<2x128xf32> -> vector<2x128xf32>
    %c0_3 = arith.constant 0 : index
    %c0_4 = arith.constant 0 : index
    %3 = vector.load %arg3[%c0_3, %c0_4] : memref<1x128xf32, #tpu.memory_space<vmem>>, vector<1x128xf32>
    %4 = vector.broadcast %3 : vector<1x128xf32> to vector<2x128xf32>
    %5 = arith.addf %2, %4 : vector<2x128xf32>
    %cst_5 = arith.constant 0.000000e+00 : f32
    %6 = vector.broadcast %cst_5 : f32 to vector<2x128xf32>
    %7 = arith.maximumf %5, %6 : vector<2x128xf32>
    %c0_6 = arith.constant 0 : index
    %c0_7 = arith.constant 0 : index
    %8 = vector.load %arg4[%c0_6, %c0_7] : memref<128x128xf32, #tpu.memory_space<vmem>>, vector<128x128xf32>
    %cst_8 = arith.constant dense<0.000000e+00> : vector<2x128xf32>
    %9 = tpu.matmul %7, %8, %cst_8 {dimension_numbers = #tpu.dot_dimension_numbers<[1], [0], [0], [1], [0, 0, 1, 1], [], []>} : vector<2x128xf32>, vector<128x128xf32>, vector<2x128xf32> -> vector<2x128xf32>
    %c0_9 = arith.constant 0 : index
    %c0_10 = arith.constant 0 : index
    %10 = vector.load %arg5[%c0_9, %c0_10] : memref<1x128xf32, #tpu.memory_space<vmem>>, vector<1x128xf32>
    %11 = vector.broadcast %10 : vector<1x128xf32> to vector<2x128xf32>
    %12 = arith.addf %9, %11 : vector<2x128xf32>
    %cst_11 = arith.constant 0.000000e+00 : f32
    %13 = vector.broadcast %cst_11 : f32 to vector<2x128xf32>
    %14 = arith.maximumf %12, %13 : vector<2x128xf32>
    %c0_12 = arith.constant 0 : index
    %c0_13 = arith.constant 0 : index
    %15 = vector.load %arg6[%c0_12, %c0_13] : memref<128x4xf32, #tpu.memory_space<vmem>>, vector<128x4xf32>
    %cst_14 = arith.constant dense<0.000000e+00> : vector<2x4xf32>
    %16 = tpu.matmul %14, %15, %cst_14 {dimension_numbers = #tpu.dot_dimension_numbers<[1], [0], [0], [1], [0, 0, 1, 1], [], []>} : vector<2x128xf32>, vector<128x4xf32>, vector<2x4xf32> -> vector<2x4xf32>
    %c0_15 = arith.constant 0 : index
    %c0_16 = arith.constant 0 : index
    %17 = vector.load %arg7[%c0_15, %c0_16] : memref<1x4xf32, #tpu.memory_space<vmem>>, vector<1x4xf32>
    %18 = vector.broadcast %17 : vector<1x4xf32> to vector<2x4xf32>
    %19 = arith.addf %16, %18 : vector<2x4xf32>
    %20 = math.tanh %19 : vector<2x4xf32>
    %c0_17 = arith.constant 0 : index
    %c0_18 = arith.constant 0 : index
    %21 = vector.load %arg8[%c0_17, %c0_18] : memref<2x4xf32, #tpu.memory_space<vmem>>, vector<2x4xf32>
    tpu.vector_store %arg8[%c0_17, %c0_18], %20 {strides = array<i32>} : memref<2x4xf32, #tpu.memory_space<vmem>>, vector<2x4xf32>,
    return
  }
  func.func @transform_0(%arg0: i32) -> (i32, i32) {
    %c0_i32 = arith.constant 0 : i32
    %c0_i32_0 = arith.constant 0 : i32
    return %arg0, %c0_i32 : i32, i32
  }
  func.func @transform_1(%arg0: i32) -> (i32, i32) {
    %c0_i32 = arith.constant 0 : i32
    %c0_i32_0 = arith.constant 0 : i32
    %c0_i32_1 = arith.constant 0 : i32
    return %c0_i32, %c0_i32_0 : i32, i32
  }
  func.func @transform_2(%arg0: i32) -> (i32, i32) {
    %c0_i32 = arith.constant 0 : i32
    %c0_i32_0 = arith.constant 0 : i32
    %c0_i32_1 = arith.constant 0 : i32
    return %c0_i32, %c0_i32_0 : i32, i32
  }
  func.func @transform_3(%arg0: i32) -> (i32, i32) {
    %c0_i32 = arith.constant 0 : i32
    %c0_i32_0 = arith.constant 0 : i32
    %c0_i32_1 = arith.constant 0 : i32
    return %c0_i32, %c0_i32_0 : i32, i32
  }
  func.func @transform_4(%arg0: i32) -> (i32, i32) {
    %c0_i32 = arith.constant 0 : i32
    %c0_i32_0 = arith.constant 0 : i32
    %c0_i32_1 = arith.constant 0 : i32
    return %c0_i32, %c0_i32_0 : i32, i32
  }
  func.func @transform_5(%arg0: i32) -> (i32, i32) {
    %c0_i32 = arith.constant 0 : i32
    %c0_i32_0 = arith.constant 0 : i32
    %c0_i32_1 = arith.constant 0 : i32
    return %c0_i32, %c0_i32_0 : i32, i32
  }
  func.func @transform_6(%arg0: i32) -> (i32, i32) {
    %c0_i32 = arith.constant 0 : i32
    %c0_i32_0 = arith.constant 0 : i32
    %c0_i32_1 = arith.constant 0 : i32
    return %c0_i32, %c0_i32_0 : i32, i32
  }
  func.func @transform_7(%arg0: i32) -> (i32, i32) {
    %c0_i32 = arith.constant 0 : i32
    %c0_i32_0 = arith.constant 0 : i32
    return %arg0, %c0_i32 : i32, i32
  }
}

</mosaic_0001>

<bundles_post_ra>
// kernel: tpu_custom_call.1
= control target key start
LH: loop header
LB: loop body
LE: loop exit
PB: predicated region body
PF: predicated region fallthrough
CT: control target
= control target key end

     0   :  { %12 = vsyncpa [#allocation3], 0  ;;  %s701_s0 = inlined_call_operand.vmem [shape: f32[2,16], index: 0, kind: input, shape index: {}]   ;;  %s702_s1 = inlined_call_operand.hbm [shape: f32[16,128], index: 1, kind: input, shape index: {}]   ;;  %s703_s2 = inlined_call_operand.vmem [shape: f32[1,128], index: 2, kind: input, shape index: {}]   ;;  %s704_s3 = inlined_call_operand.vmem [shape: f32[128,128], index: 3, kind: input, shape index: {}]   ;;  %s705_s4 = inlined_call_operand.vmem [shape: f32[1,128], index: 4, kind: input, shape index: {}]   ;;  %s706_s5 = inlined_call_operand.vmem [shape: f32[128,4], index: 5, kind: input, shape index: {}]   ;;  %s707_s6 = inlined_call_operand.vmem [shape: f32[1,4], index: 6, kind: input, shape index: {}]   ;;  %s708_s7 = inlined_call_operand.hbm [shape: f32[2,4], index: 7, kind: output, shape index: {}]  }
   0x1   :  { %13 = vsyncpa [#allocation4], 0  ;;  %s501_s24 = smov [#allocation2]  }
   0x2   :  { %s21_s25 = sshll.u32 %s501_s24, 4  ;;  %s22_s25 = int_to_ptr.vmem [resolvable:$true] %s21_s25 }
   0x3   :  { %s465_s26 = scalar_lea.vmem %s22_s25, 256  ;;  %p470_p1 = scmp.lt.s32.totalorder %s22_s25, %s22_s25 }
   0x4   :  { %p466_p0 = scmp.ne.s32.totalorder %s22_s25, %s465_s26  ;;  %p471_p2 = scmp.lt.s32.totalorder %s465_s26, %s465_s26 }
   0x6   :  { %p472_p3 = por %p471_p2, %p470_p1 }
   0x8   :  { %p473_p4 = pnand %p472_p3, %p466_p0 }
   0xa   :  { %476 = shalt.err (!%p473_p4)
}
   0xb   :  { %s502_s27 = smov 128   ;;  %s503_s28 = smov 8  }
   0xc   :  { %27 = dma.hbm_to_vmem [thread:$0]  %s702_s1, 256, %s22_s25, [#allocation3], %s502_s27, %s502_s27, %s503_s28  }
   0xd   :  { %497 = dma.done.wait [#allocation3], 256  }
   0xe   :  { %498 = vsyncadd [#allocation3], 4294967040  ;;  %v504_v0 = vmov 0.0   ;;  %vm505_vm0 = vmmov 0   ;;  %v43_v1 = vld [vmem:[#allocation2 + $0x8] sm:$0xff]  ;;  %v42_v2 = vld [vmem:[#allocation2] sm:$0xff] }
   0xf   :  { %372 = vmatprep.subr.mxu0 %v504_v0  ;;  %376 = vmatprep.mubr.msk.f32.mxu0 %vm505_vm0, %v504_v0  ;;  %v41_v3 = vld [vmem:[%s701_s0] sm:$0x3]  ;;  %vm51_vm1 = vcmask 130048   ;;  %v141_v4 = vld [vmem:[%s704_s3 + $0x78] sm:$0xff]  ;;  %v140_v5 = vld [vmem:[%s704_s3 + $0x70] sm:$0xff]  ;;  %s506_s25 = smov [#allocation5]  }
  0x10   :  { %379 = vmatprep.subr.mxu1 %v504_v0  ;;  %411 = vmatprep.mubr.msk.f32.mxu1 %vm505_vm0, %v504_v0  ;;  %v139_v6 = vld [vmem:[%s704_s3 + $0x68] sm:$0xff]  ;;  %v138_v7 = vld [vmem:[%s704_s3 + $0x60] sm:$0xff]  ;;  %v137_v8 = vld [vmem:[%s704_s3 + $0x58] sm:$0xff]  ;;  %vm314_vm2 = vcmask 25600  }
  0x11   :  { %373 = vmatpush3.msra.mxu0 %v43_v1  ;;  %380 = vmatpush3.msra.mxu1 %v141_v4  ;;  %v136_v9 = vld [vmem:[%s704_s3 + $0x50] sm:$0xff]  ;;  %v135_v10 = vld [vmem:[%s704_s3 + $0x48] sm:$0xff]  ;;  %v134_v11 = vld [vmem:[%s704_s3 + $0x40] sm:$0xff] }
  0x12   :  { %374 = vmatprep.subr.mxu0 %v504_v0  ;;  %381 = vmatprep.subr.mxu1 %v504_v0  ;;  %v133_v12 = vld [vmem:[%s704_s3 + $0x38] sm:$0xff]  ;;  %v132_v13 = vld [vmem:[%s704_s3 + $0x30] sm:$0xff]  ;;  %v131_v14 = vld [vmem:[%s704_s3 + $0x28] sm:$0xff] }
  0x13   :  { %375 = vmatpush3.msra.mxu0 %v42_v2  ;;  %382 = vmatpush3.msra.mxu1 %v140_v5  ;;  %v130_v15 = vld [vmem:[%s704_s3 + $0x20] sm:$0xff]  ;;  %v129_v16 = vld [vmem:[%s704_s3 + $0x18] sm:$0xff]  ;;  %v128_v17 = vld [vmem:[%s704_s3 + $0x10] sm:$0xff] }
  0x14   :  { %377 = vmatmul.mubr.msk.f32.vlgmr.msra.gmra.mxu0 %vm51_vm1, %v41_v3  ;;  %383 = vmatprep.subr.mxu1 %v504_v0  ;;  %v127_v18 = vld [vmem:[%s704_s3 + $0x8] sm:$0xff]  ;;  %v126_v19 = vld [vmem:[%s704_s3] sm:$0xff]  ;;  %v235_v20 = vld [vmem:[%s706_s5 + $0x78] sm:$0xff] }
  0x15   :  { %414 = vmatprep.subr.mxu0 %v504_v0  ;;  %384 = vmatpush3.msra.mxu1 %v139_v6  ;;  %v234_v21 = vld [vmem:[%s706_s5 + $0x70] sm:$0xff]  ;;  %v233_v22 = vld [vmem:[%s706_s5 + $0x68] sm:$0xff]  ;;  %v232_v23 = vld [vmem:[%s706_s5 + $0x60] sm:$0xff] }
  0x16   :  { %446 = vmatprep.mubr.msk.f32.mxu0 %vm505_vm0, %v504_v0  ;;  %385 = vmatprep.subr.mxu1 %v504_v0  ;;  %v231_v24 = vld [vmem:[%s706_s5 + $0x58] sm:$0xff]  ;;  %v230_v25 = vld [vmem:[%s706_s5 + $0x50] sm:$0xff]  ;;  %v229_v26 = vld [vmem:[%s706_s5 + $0x48] sm:$0xff] }
  0x17   :  { %386 = vmatpush3.msra.mxu1 %v138_v7  ;;  %415 = vmatpush3.msra.mxu0 %v235_v20  ;;  %v228_v27 = vld [vmem:[%s706_s5 + $0x40] sm:$0xff]  ;;  %v227_v28 = vld [vmem:[%s706_s5 + $0x38] sm:$0xff]  ;;  %v226_v29 = vld [vmem:[%s706_s5 + $0x30] sm:$0xff] }
  0x18   :  { %387 = vmatprep.subr.mxu1 %v504_v0  ;;  %416 = vmatprep.subr.mxu0 %v504_v0  ;;  %v225_v30 = vld [vmem:[%s706_s5 + $0x28] sm:$0xff]  ;;  %v224_v31 = vld [vmem:[%s706_s5 + $0x20] sm:$0xff]  ;;  %v223_v32 = vld [vmem:[%s706_s5 + $0x18] sm:$0xff] }
  0x19   :  { %388 = vmatpush3.msra.mxu1 %v137_v8  ;;  %417 = vmatpush3.msra.mxu0 %v234_v21  ;;  %v331_v33 = vld [vmem:[%s703_s2] ss:$0 sm:$0xff]  ;;  %v222_v38 = vld [vmem:[%s706_s5 + $0x10] sm:$0xff]  ;;  %v221_v39 = vld [vmem:[%s706_s5 + $0x8] sm:$0xff] }
  0x1a   :  { %389 = vmatprep.subr.mxu1 %v504_v0  ;;  %418 = vmatprep.subr.mxu0 %v504_v0  ;;  %v220_v40 = vld [vmem:[%s706_s5] sm:$0xff]  ;;  %s322_s5 = sshll.u32 %s506_s25, 4  ;;  %s323_s5 = int_to_ptr.vmem [resolvable:$true] %s322_s5 }
  0x1b   :  { %390 = vmatpush3.msra.mxu1 %v136_v9  ;;  %419 = vmatpush3.msra.mxu0 %v233_v22  ;;  %v333_v41 = vld [vmem:[%s705_s4] ss:$0 sm:$0xff]  ;;  %s477_s4 = scalar_lea.vmem %s323_s5, 32  ;;  %p482_p6 = scmp.lt.s32.totalorder %s323_s5, %s323_s5 }
  0x1c   :  { %391 = vmatprep.subr.mxu1 %v504_v0  ;;  %420 = vmatprep.subr.mxu0 %v504_v0  ;;  %v334_v46 = vld [vmem:[%s707_s6] ss:$0 sm:$0xff]  ;;  %p478_p5 = scmp.ne.s32.totalorder %s323_s5, %s477_s4  ;;  %p483_p7 = scmp.lt.s32.totalorder %s477_s4, %s477_s4 }
  0x1d   :  { %392 = vmatpush3.msra.mxu1 %v135_v10  ;;  %421 = vmatpush3.msra.mxu0 %v232_v23 }
  0x1e   :  { %393 = vmatprep.subr.mxu1 %v504_v0  ;;  %422 = vmatprep.subr.mxu0 %v504_v0  ;;  %p484_p8 = por %p483_p7, %p482_p6 }
  0x1f   :  { %394 = vmatpush3.msra.mxu1 %v134_v11  ;;  %423 = vmatpush3.msra.mxu0 %v231_v24 }
  0x20   :  { %395 = vmatprep.subr.mxu1 %v504_v0  ;;  %424 = vmatprep.subr.mxu0 %v504_v0  ;;  %p485_p9 = pnand %p484_p8, %p478_p5 }
  0x21   :  { %396 = vmatpush3.msra.mxu1 %v133_v12  ;;  %425 = vmatpush3.msra.mxu0 %v230_v25 }
  0x22   :  { %397 = vmatprep.subr.mxu1 %v504_v0  ;;  %426 = vmatprep.subr.mxu0 %v504_v0 }
  0x23   :  { %398 = vmatpush3.msra.mxu1 %v132_v13  ;;  %427 = vmatpush3.msra.mxu0 %v229_v26 }
  0x24   :  { %399 = vmatprep.subr.mxu1 %v504_v0  ;;  %428 = vmatprep.subr.mxu0 %v504_v0 }
  0x25   :  { %400 = vmatpush3.msra.mxu1 %v131_v14  ;;  %429 = vmatpush3.msra.mxu0 %v228_v27 }
  0x26   :  { %401 = vmatprep.subr.mxu1 %v504_v0  ;;  %430 = vmatprep.subr.mxu0 %v504_v0 }
  0x27   :  { %402 = vmatpush3.msra.mxu1 %v130_v15  ;;  %431 = vmatpush3.msra.mxu0 %v227_v28 }
  0x28   :  { %403 = vmatprep.subr.mxu1 %v504_v0  ;;  %432 = vmatprep.subr.mxu0 %v504_v0 }
  0x29   :  { %404 = vmatpush3.msra.mxu1 %v129_v16  ;;  %433 = vmatpush3.msra.mxu0 %v226_v29 }
  0x2a   :  { %405 = vmatprep.subr.mxu1 %v504_v0  ;;  %434 = vmatprep.subr.mxu0 %v504_v0 }
  0x2b   :  { %406 = vmatpush3.msra.mxu1 %v128_v17  ;;  %435 = vmatpush3.msra.mxu0 %v225_v30 }
  0x2c   :  { %407 = vmatprep.subr.mxu1 %v504_v0  ;;  %436 = vmatprep.subr.mxu0 %v504_v0 }
  0x2d   :  { %408 = vmatpush3.msra.mxu1 %v127_v18  ;;  %437 = vmatpush3.msra.mxu0 %v224_v31 }
  0x2e   :  { %409 = vmatprep.subr.mxu1 %v504_v0  ;;  %438 = vmatprep.subr.mxu0 %v504_v0 }
  0x2f   :  { %410 = vmatpush3.msra.mxu1 %v126_v19  ;;  %439 = vmatpush3.msra.mxu0 %v223_v32 }
  0x30   :  { %440 = vmatprep.subr.mxu0 %v504_v0 }
  0x31   :  { %441 = vmatpush3.msra.mxu0 %v222_v38 }
  0x32   :  { %442 = vmatprep.subr.mxu0 %v504_v0 }
  0x33   :  { %443 = vmatpush3.msra.mxu0 %v221_v39 }
  0x34   :  { %444 = vmatprep.subr.mxu0 %v504_v0 }
  0x35   :  { %445 = vmatpush3.msra.mxu0 %v220_v40 }
  0xd4   :  { %v121_v34 = vpop.f32.mrf.mxu0 }
  0xd5   :  { %v122_v35 = vadd.f32 %v331_v33, %v121_v34 }
  0xd6   :  { %v378_v36 = vpop.f32.mrf.mxu0 }
  0xd7   :  { %v125_v37 = vmax.f32 %v122_v35, 0.0 }
  0xd9   :  { %412 = vmatmul.mubr.f32.vlgmr.msra.gmra.mxu1 %v125_v37 }
 0x199   :  { %v215_v42 = vpop.f32.mrf.mxu1 }
 0x19a   :  { %v216_v43 = vadd.f32 %v333_v41, %v215_v42 }
 0x19b   :  { %v413_v44 = vpop.f32.mrf.mxu1 }
 0x19c   :  { %v219_v45 = vmax.f32 %v216_v43, 0.0 }
 0x19e   :  { %447 = vmatmul.mubr.f32.vlgmr.msra.gmra.mxu0 %v219_v45 }
 0x25e   :  { %v309_v47 = vpop.f32.mrf.mxu0 }
 0x25f   :  { %v310_v48 = vadd.f32 %v334_v46, %v309_v47 }
 0x260   :  { %v448_v49 = vpop.f32.mrf.mxu0 }
 0x261   :  { %455 = vtanh.f32 %v310_v48 }
 0x26e   :  { %v456_v50 = vpop.eup %455 }
 0x26f   :  { %315 = vst.msk [vmem:[#allocation5] sm:$0x3] %vm314_vm2, %v456_v50 }
 0x270   :  { %488 = shalt.err (!%p485_p9)
}
 0x271   :  { %325 = dma.vmem_to_hbm [thread:$0]  %s323_s5, 32, %s708_s7, [#allocation4]  }
 0x272   :  { %499 = dma.done.wait [#allocation4], 32  }
 0x273   :  { %500 = vsyncadd [#allocation4], 4294967264 }
 0x274   :  { %329 = vsyncpa [#allocation3], 1 }
 0x275   :  { %330 = vsyncpa [#allocation4], 1 }

</bundles_post_ra>
